<compile_context>
chip_gen: v6e
topology: v6e:2x2x1
jax: 0.10.0
libtpu: 0.0.40
codegen_flags: <defaults>
</compile_context>

<pallas_src>
import jax
import jax.numpy as jnp
from jax.experimental import pallas as pl
from jax.experimental.pallas import tpu as pltpu


def _output_module_kernel(q_ref, h_ref, hw_ref, hb_ref, y_ref):
    # q_ref: (TB, E), h_ref: (TB, M, E), hw_ref: (E, E), hb_ref: (1, E),
    # y_ref: (TB, E).  All math in f32 (cast up once after load).
    q = q_ref[...].astype(jnp.float32)                  # (TB, E)
    h = h_ref[...].astype(jnp.float32)                  # (TB, M, E)

    # attention scores: s[b, m] = <h[b, m, :], q[b, :]>   (== h.bmm(q))
    # q broadcast is emitted once; reduce over E is a lane-reduce (XLU).
    s = jnp.sum(h * q[:, None, :], axis=-1)              # (TB, M)

    # numerically-stable softmax over the memory-slot axis (torch dim=1)
    s_max = jnp.max(s, axis=-1, keepdims=True)            # (TB, 1)
    e = jnp.exp(s - s_max)                                # (TB, M)
    denom = jnp.sum(e, axis=-1, keepdims=True)            # (TB, 1)
    p = e * pl.reciprocal(denom, approx=False)            # (TB, M), exact recip

    # u[b, :] = sum_m p[b, m] * h[b, m, :]                (== (p*h).sum(1))
    u = jnp.sum(p[:, :, None] * h, axis=1)                # (TB, E)

    # y = q + u @ W^T + b   — one full-width MXU matmul per grid step
    y = q + jnp.dot(u, hw_ref[...],
                    preferred_element_type=jnp.float32) + hb_ref[...]
    y_ref[...] = y.astype(y_ref.dtype)


def output_module_forward(q, h, H_weight, H_bias, *, block_b=512):
    """q: (B, E, 1), h: (B, M, E), H_weight: (E, E), H_bias: (E,) -> y: (B, E)."""
    B, E, _ = q.shape
    M = h.shape[1]

    q2 = q[:, :, 0]                       # (B, E): squeeze, no host transpose
    hw_t = H_weight.T                     # (E, E): u @ hw_t == u @ W^T
    hb = H_bias.reshape(1, E)

    # Batch tile: multiple of 8 (sublane), capped at block_b rows.
    # VMEM per step ~ 2*(TB*M*E + 2*TB*E)*4 B + E*E*4 B; at TB=512, M=8, E=32
    # that's well under v7x's 64 MiB (and v5e/v6e's 128 MiB).
    TB = max(8, min(block_b, -(-B // 8) * 8))
    B_pad = pl.cdiv(B, TB) * TB
    if B_pad != B:
        pad = B_pad - B                   # zero-padded rows produce y = bias; sliced off
        q2 = jnp.pad(q2, ((0, pad), (0, 0)))
        h = jnp.pad(h, ((0, pad), (0, 0), (0, 0)))

    y = pl.pallas_call(
        _output_module_kernel,
        out_shape=jax.ShapeDtypeStruct((B_pad, E), q.dtype),
        grid=(B_pad // TB,),
        in_specs=[
            pl.BlockSpec((TB, E), lambda b: (b, 0)),        # q (squeezed)
            pl.BlockSpec((TB, M, E), lambda b: (b, 0, 0)),  # h
            pl.BlockSpec((E, E), lambda b: (0, 0)),         # H weight^T (resident)
            pl.BlockSpec((1, E), lambda b: (0, 0)),         # H bias (resident)
        ],
        out_specs=pl.BlockSpec((TB, E), lambda b: (b, 0)),  # lane-dense 2-D store
        compiler_params=pltpu.CompilerParams(
            dimension_semantics=("parallel",)),
    )(q2, h, hw_t, hb)
    return y[:B]


if __name__ == "__main__":
    B, M, E, OUT = 2, 8, 32, 16   # batch, memory slots, embedding_dim, output_dim
    key = jax.random.PRNGKey(0)
    kq, kh, kw, kb, kr, krb = jax.random.split(key, 6)

    q = jax.random.normal(kq, (B, E, 1), jnp.float32)
    h = jax.random.normal(kh, (B, M, E), jnp.float32)

    # Deterministic parameter init (shapes from __init__).
    H_weight = jax.random.normal(kw, (E, E), jnp.float32) * 0.1   # nn.Linear(E, E)
    H_bias = jax.random.normal(kb, (E,), jnp.float32) * 0.1
    # Defined in __init__ but unused in forward():
    R_weight = jax.random.normal(kr, (OUT, E), jnp.float32) * 0.1  # nn.Linear(E, OUT)
    R_bias = jax.random.normal(krb, (OUT,), jnp.float32) * 0.1
    prelu_alpha = jnp.array(0.25, jnp.float32)                     # nn.PReLU()
    del R_weight, R_bias, prelu_alpha  # not used in the forward pass

    y = output_module_forward(q, h, H_weight, H_bias)
    jax.block_until_ready(y)

    # Pure-JAX reference of the exact torch semantics.
    s_ref = jnp.einsum('bme,bei->bmi', h, q)          # h.bmm(q): (B, M, 1)
    p_ref = jax.nn.softmax(s_ref, axis=1)
    u_ref = jnp.sum(p_ref * h, axis=1)                # (B, E)
    y_ref = q[:, :, 0] + (u_ref @ H_weight.T + H_bias)

    assert jnp.allclose(y, y_ref, atol=1e-5, rtol=1e-5), \
        float(jnp.max(jnp.abs(y - y_ref)))
    print("KERNEL_OK")
</pallas_src>

<mosaic_0001>
module attributes {stable_mosaic.version = 11 : i64} {
  func.func @_output_module_kernel(%arg0: i32, %arg1: memref<8x32xf32, #tpu.memory_space<vmem>>, %arg2: memref<8x8x32xf32, #tpu.memory_space<vmem>>, %arg3: memref<32x32xf32, #tpu.memory_space<vmem>>, %arg4: memref<1x32xf32, #tpu.memory_space<vmem>>, %arg5: memref<8x32xf32, #tpu.memory_space<vmem>>) attributes {dimension_semantics = [#tpu.dimension_semantics<parallel>], iteration_bounds = array<i64: 1>, scalar_prefetch = 0 : i64, scratch_operands = 0 : i64, tpu.core_type = #tpu.core_type<tc>, window_params = [{transform_indices = @transform_0, window_bounds = array<i64: 8, 32>}, {transform_indices = @transform_1, window_bounds = array<i64: 8, 8, 32>}, {pipeline_mode = #tpu.pipeline_mode<synchronous>, transform_indices = @transform_2, window_bounds = array<i64: 32, 32>}, {pipeline_mode = #tpu.pipeline_mode<synchronous>, transform_indices = @transform_3, window_bounds = array<i64: 1, 32>}, {transform_indices = @transform_4, window_bounds = array<i64: 8, 32>}]} {
    %c0 = arith.constant 0 : index
    %c0_0 = arith.constant 0 : index
    %0 = vector.load %arg1[%c0, %c0_0] : memref<8x32xf32, #tpu.memory_space<vmem>>, vector<8x32xf32>
    %c0_1 = arith.constant 0 : index
    %c0_2 = arith.constant 0 : index
    %c0_3 = arith.constant 0 : index
    %1 = vector.load %arg2[%c0_1, %c0_2, %c0_3] : memref<8x8x32xf32, #tpu.memory_space<vmem>>, vector<8x8x32xf32>
    %2 = vector.shape_cast %0 : vector<8x32xf32> to vector<8x1x32xf32>
    %3 = vector.broadcast %2 : vector<8x1x32xf32> to vector<8x8x32xf32>
    %4 = arith.mulf %1, %3 : vector<8x8x32xf32>
    %cst = arith.constant dense<0.000000e+00> : vector<8x8xf32>
    %5 = vector.multi_reduction <add>, %4, %cst [2] : vector<8x8x32xf32> to vector<8x8xf32>
    %cst_4 = arith.constant dense<0xFF800000> : vector<8xf32>
    %6 = vector.multi_reduction <maximumf>, %5, %cst_4 [1] : vector<8x8xf32> to vector<8xf32>
    %7 = vector.shape_cast %6 : vector<8xf32> to vector<8x1xf32>
    %8 = vector.broadcast %7 : vector<8x1xf32> to vector<8x8xf32>
    %9 = arith.subf %5, %8 : vector<8x8xf32>
    %10 = math.exp %9 : vector<8x8xf32>
    %cst_5 = arith.constant dense<0.000000e+00> : vector<8xf32>
    %11 = vector.multi_reduction <add>, %10, %cst_5 [1] : vector<8x8xf32> to vector<8xf32>
    %12 = vector.shape_cast %11 : vector<8xf32> to vector<8x1xf32>
    %13 = tpu.reciprocal %12 : vector<8x1xf32> -> vector<8x1xf32>
    %14 = vector.broadcast %13 : vector<8x1xf32> to vector<8x8xf32>
    %15 = arith.mulf %10, %14 : vector<8x8xf32>
    %16 = vector.shape_cast %15 : vector<8x8xf32> to vector<8x8x1xf32>
    %17 = vector.broadcast %16 : vector<8x8x1xf32> to vector<8x8x32xf32>
    %18 = arith.mulf %17, %1 : vector<8x8x32xf32>
    %cst_6 = arith.constant dense<0.000000e+00> : vector<8x32xf32>
    %19 = vector.multi_reduction <add>, %18, %cst_6 [1] : vector<8x8x32xf32> to vector<8x32xf32>
    %c0_7 = arith.constant 0 : index
    %c0_8 = arith.constant 0 : index
    %20 = vector.load %arg3[%c0_7, %c0_8] : memref<32x32xf32, #tpu.memory_space<vmem>>, vector<32x32xf32>
    %cst_9 = arith.constant dense<0.000000e+00> : vector<8x32xf32>
    %21 = tpu.matmul %19, %20, %cst_9 {dimension_numbers = #tpu.dot_dimension_numbers<[1], [0], [0], [1], [0, 0, 1, 1], [], []>} : vector<8x32xf32>, vector<32x32xf32>, vector<8x32xf32> -> vector<8x32xf32>
    %22 = arith.addf %0, %21 : vector<8x32xf32>
    %c0_10 = arith.constant 0 : index
    %c0_11 = arith.constant 0 : index
    %23 = vector.load %arg4[%c0_10, %c0_11] : memref<1x32xf32, #tpu.memory_space<vmem>>, vector<1x32xf32>
    %24 = vector.broadcast %23 : vector<1x32xf32> to vector<8x32xf32>
    %25 = arith.addf %22, %24 : vector<8x32xf32>
    %c0_12 = arith.constant 0 : index
    %c0_13 = arith.constant 0 : index
    %26 = vector.load %arg5[%c0_12, %c0_13] : memref<8x32xf32, #tpu.memory_space<vmem>>, vector<8x32xf32>
    tpu.vector_store %arg5[%c0_12, %c0_13], %25 {strides = array<i32>} : memref<8x32xf32, #tpu.memory_space<vmem>>, vector<8x32xf32>,
    return
  }
  func.func @transform_0(%arg0: i32) -> (i32, i32) {
    %c0_i32 = arith.constant 0 : i32
    %c0_i32_0 = arith.constant 0 : i32
    return %arg0, %c0_i32 : i32, i32
  }
  func.func @transform_1(%arg0: i32) -> (i32, i32, i32) {
    %c0_i32 = arith.constant 0 : i32
    %c0_i32_0 = arith.constant 0 : i32
    %c0_i32_1 = arith.constant 0 : i32
    return %arg0, %c0_i32, %c0_i32_0 : i32, i32, i32
  }
  func.func @transform_2(%arg0: i32) -> (i32, i32) {
    %c0_i32 = arith.constant 0 : i32
    %c0_i32_0 = arith.constant 0 : i32
    %c0_i32_1 = arith.constant 0 : i32
    return %c0_i32, %c0_i32_0 : i32, i32
  }
  func.func @transform_3(%arg0: i32) -> (i32, i32) {
    %c0_i32 = arith.constant 0 : i32
    %c0_i32_0 = arith.constant 0 : i32
    %c0_i32_1 = arith.constant 0 : i32
    return %c0_i32, %c0_i32_0 : i32, i32
  }
  func.func @transform_4(%arg0: i32) -> (i32, i32) {
    %c0_i32 = arith.constant 0 : i32
    %c0_i32_0 = arith.constant 0 : i32
    return %arg0, %c0_i32 : i32, i32
  }
}

</mosaic_0001>

<bundles_post_ra>
// kernel: tpu_custom_call.1
= control target key start
LH: loop header
LB: loop body
LE: loop exit
PB: predicated region body
PF: predicated region fallthrough
CT: control target
= control target key end

     0   :  { %9 = vsyncpa [#allocation3], 0  ;;  %s995_s0 = inlined_call_operand.hbm [shape: f32[8,32], index: 0, kind: input, shape index: {}]   ;;  %s996_s1 = inlined_call_operand.hbm [shape: f32[8,8,32], index: 1, kind: input, shape index: {}]   ;;  %s997_s2 = inlined_call_operand.hbm [shape: f32[32,32], index: 2, kind: input, shape index: {}]   ;;  %s998_s3 = inlined_call_operand.vmem [shape: f32[1,32], index: 3, kind: input, shape index: {}]   ;;  %s999_s4 = inlined_call_operand.hbm [shape: f32[8,32], index: 4, kind: output, shape index: {}]  }
   0x1   :  { %10 = vsyncpa [#allocation6], 0 }
   0x2   :  { %11 = vsyncpa [#allocation4], 0  ;;  %s796_s15 = smov [#allocation5]  }
   0x3   :  { %s27_s16 = sshll.u32 %s796_s15, 4  ;;  %s28_s16 = int_to_ptr.vmem [resolvable:$true] %s27_s16 }
   0x4   :  { %s718_s17 = scalar_lea.vmem %s28_s16, 1024  ;;  %p723_p1 = scmp.lt.s32.totalorder %s28_s16, %s28_s16 }
   0x5   :  { %p719_p0 = scmp.ne.s32.totalorder %s28_s16, %s718_s17  ;;  %p724_p2 = scmp.lt.s32.totalorder %s718_s17, %s718_s17 }
   0x7   :  { %p725_p3 = por %p724_p2, %p723_p1 }
   0x9   :  { %p726_p4 = pnand %p725_p3, %p719_p0 }
   0xb   :  { %729 = shalt.err (!%p726_p4)
}
   0xc   :  { %s797_s18 = smov 128   ;;  %s798_s19 = smov 8  }
   0xd   :  { %33 = dma.hbm_to_vmem [thread:$0]  %s996_s1, 1024, %s28_s16, [#allocation6], %s797_s18, %s797_s18, %s798_s19  }
   0xe   :  { %s799_s22 = smov [#allocation2]   ;;  %s800_s24 = smov [#allocation7]  }
   0xf   :  { %s18_s23 = sshll.u32 %s799_s22, 4  ;;  %s39_s25 = sshll.u32 %s800_s24, 4  ;;  %s19_s23 = int_to_ptr.vmem [resolvable:$true] %s18_s23  ;;  %s40_s25 = int_to_ptr.vmem [resolvable:$true] %s39_s25 }
  0x10   :  { %s738_s26 = scalar_lea.vmem %s19_s23, 128  ;;  %p743_p6 = scmp.lt.s32.totalorder %s19_s23, %s19_s23 }
  0x11   :  { %p739_p5 = scmp.ne.s32.totalorder %s19_s23, %s738_s26  ;;  %p744_p7 = scmp.lt.s32.totalorder %s738_s26, %s738_s26 }
  0x13   :  { %p745_p8 = por %p744_p7, %p743_p6 }
  0x15   :  { %p746_p9 = pnand %p745_p8, %p739_p5 }
  0x17   :  { %749 = shalt.err (!%p746_p9)
}
  0x18   :  { %21 = dma.hbm_to_vmem [thread:$0]  %s995_s0, 128, %s19_s23, [#allocation3]  }
  0x19   :  { %s758_s29 = scalar_lea.vmem %s40_s25, 512  ;;  %p763_p11 = scmp.lt.s32.totalorder %s40_s25, %s40_s25 }
  0x1a   :  { %p759_p10 = scmp.ne.s32.totalorder %s40_s25, %s758_s29  ;;  %p764_p12 = scmp.lt.s32.totalorder %s758_s29, %s758_s29 }
  0x1c   :  { %p765_p13 = por %p764_p12, %p763_p11 }
  0x1e   :  { %p766_p0 = pnand %p765_p13, %p759_p10 }
  0x20   :  { %769 = shalt.err (!%p766_p0)
}
  0x21   :  { %45 = dma.hbm_to_vmem [thread:$0]  %s997_s2, 512, %s40_s25, [#allocation6], %s797_s18, %s797_s18, %s798_s19  }
  0x22   :  { %790 = dma.done.wait [#allocation3], 128  }
  0x23   :  { %791 = vsyncadd [#allocation3], 4294967168 }
  0x24   :  { %792 = dma.done.wait [#allocation6], 1536  }
  0x25   :  { %793 = vsyncadd [#allocation6], 4294965760  ;;  %v71_v0 = vlaneseq  ;;  %v801_v1 = vmov 1966171168   ;;  %v846_v8 = vld [vmem:[#allocation2] sm:$0xff]  ;;  %v854_v15 = vld [vmem:[#allocation5] sm:$0xff] }
  0x26   :  { %v69_v2 = vunpack.c.l.s4 %v801_v1  ;;  %v67_v11 = vcombine.high %v846_v8, %v846_v8  ;;  %vm164_vm0 = vcmask 261120   ;;  %v857_v20 = vld [vmem:[#allocation5 + $0x10] sm:$0xff]  ;;  %v859_v21 = vld [vmem:[#allocation5 + $0x8] sm:$0xff]  ;;  %v864_v27 = vld [vmem:[#allocation5 + $0x20] sm:$0xff]  ;;  %vm231_vm1 = vcmask 1041409   ;;  %s805_s5 = smov [#allocation8]  }
  0x27   :  { %v840_v3 = vshrl.u32 %v71_v0, 7  ;;  %v198_v4 = vand.u32 127, %v71_v0  ;;  %v866_v28 = vld [vmem:[#allocation5 + $0x18] sm:$0xff]  ;;  %v874_v37 = vld [vmem:[#allocation5 + $0x28] sm:$0xff]  ;;  %v881_v44 = vld [vmem:[#allocation5 + $0x30] sm:$0xff]  ;;  %vm233_vm2 = vcmask 1042434  }
  0x28   :  { %v70_v5 = vunpack.c.0.s8 %v69_v2  ;;  %v886_v48 = vld [vmem:[#allocation5 + $0x38] sm:$0xff]  ;;  %vm235_vm3 = vcmask 1043459   ;;  %vm237_vm4 = vcmask 1044484   ;;  %vm239_vm5 = vcmask 1045509   ;;  %s651_s6 = sshll.u32 %s805_s5, 4  ;;  %s652_s6 = int_to_ptr.vmem [resolvable:$true] %s651_s6 }
  0x29   :  { %v843_v6 = vsub.s32 %v198_v4, %v840_v3  ;;  %v850_v10 = vsub.s32 0, %v840_v3  ;;  %vm241_vm6 = vcmask 1046534   ;;  %vm243_vm7 = vcmask 1047559   ;;  %s770_s7 = scalar_lea.vmem %s652_s6, 128  ;;  %p775_p2 = scmp.lt.s32.totalorder %s652_s6, %s652_s6 }
  0x2a   :  { %v73_v7 = vsub.s32 %v70_v5, %v840_v3  ;;  %vm246_vm8 = vcmask 64512   ;;  %vm804_vm9 = vmmov 0   ;;  %p771_p1 = scmp.ne.s32.totalorder %s652_s6, %s770_s7  ;;  %p776_p3 = scmp.lt.s32.totalorder %s770_s7, %s770_s7 }
  0x2c   :  { %v74_v9 = vrot.slane %v846_v8, %v73_v7  ;;  %v81_v14 = vrot.slane %v67_v11, %v73_v7  ;;  %p777_p4 = por %p776_p3, %p775_p2 }
  0x2e   :  { %v90_v12 = vrot.slane %v74_v9, %v73_v7  ;;  %v82_v13 = vcombine.high %v74_v9, %v74_v9  ;;  %v97_v19 = vrot.slane %v81_v14, %v73_v7  ;;  %v83_v22 = vcombine.high %v81_v14, %v81_v14  ;;  %p778_p5 = pnand %p777_p4, %p771_p1 }
  0x30   :  { %v119_v16 = vrot.slane %v90_v12, %v850_v10  ;;  %v112_v17 = vcombine.high %v90_v12, %v90_v12  ;;  %v104_v18 = vrot.slane %v82_v13, %v73_v7  ;;  %v135_v29 = vrot.slane %v97_v19, %v850_v10 }
  0x31   :  { %v111_v30 = vrot.slane %v83_v22, %v73_v7  ;;  %v113_v31 = vcombine.high %v97_v19, %v97_v19  ;;  %v802_v22 = vmov 0  }
  0x32   :  { %v156_v23 = vmul.f32 %v119_v16, %v854_v15  ;;  %v127_v24 = vrot.slane %v112_v17, %v850_v10  ;;  %v123_v25 = vrot.slane %v104_v18, %v850_v10  ;;  %v114_v26 = vcombine.high %v104_v18, %v104_v18  ;;  %690 = vset.pattern.permute.xlu0 %v802_v22 }
  0x33   :  { %v160_v36 = vmul.f32 %v135_v29, %v864_v27  ;;  %v139_v38 = vrot.slane %v111_v30, %v850_v10  ;;  %v115_v39 = vcombine.high %v111_v30, %v111_v30  ;;  %v143_v43 = vrot.slane %v113_v31, %v850_v10  ;;  %689 = vset.pattern.permute.xlu1 %v802_v22 }
  0x34   :  { %v165_v32 = vsel %vm164_vm0, %v156_v23, 0.0  ;;  %v158_v33 = vmul.f32 %v127_v24, %v857_v20  ;;  %v157_v34 = vmul.f32 %v123_v25, %v859_v21  ;;  %v131_v35 = vrot.slane %v114_v26, %v850_v10 }
  0x35   :  { %166 = vadd.xlane.f32.xlu0 %v165_v32  ;;  %v161_v46 = vmul.f32 %v139_v38, %v874_v37  ;;  %v147_v47 = vrot.slane %v115_v39, %v850_v10  ;;  %v177_v49 = vsel %vm164_vm0, %v160_v36, 0.0  ;;  %v162_v50 = vmul.f32 %v143_v43, %v881_v44 }
  0x36   :  { %v171_v40 = vsel %vm164_vm0, %v158_v33, 0.0  ;;  %v168_v41 = vsel %vm164_vm0, %v157_v34, 0.0  ;;  %v159_v42 = vmul.f32 %v131_v35, %v866_v28  ;;  %v257_v23 = vsub.s32 1, %v840_v3 }
  0x37   :  { %172 = vadd.xlane.f32.xlu1 %v171_v40  ;;  %v180_v51 = vsel %vm164_vm0, %v161_v46, 0.0  ;;  %v163_v52 = vmul.f32 %v147_v47, %v886_v48  ;;  %v183_v53 = vsel %vm164_vm0, %v162_v50, 0.0  ;;  %v261_v24 = vsub.s32 2, %v840_v3 }
  0x38   :  { %v174_v45 = vsel %vm164_vm0, %v159_v42, 0.0  ;;  %v265_v25 = vsub.s32 3, %v840_v3  ;;  %v269_v32 = vsub.s32 4, %v840_v3  ;;  %v273_v40 = vsub.s32 5, %v840_v3 }
  0x39   :  { %169 = vadd.xlane.f32.xlu0 %v168_v41  ;;  %v186_v54 = vsel %vm164_vm0, %v163_v52, 0.0  ;;  %v281_v50 = vsub.s32 7, %v840_v3 }
  0x3b   :  { %175 = vadd.xlane.f32.xlu1 %v174_v45  ;;  %v277_v45 = vsub.s32 6, %v840_v3 }
  0x3d   :  { %178 = vadd.xlane.f32.xlu0 %v177_v49 }
  0x3f   :  { %181 = vadd.xlane.f32.xlu1 %v180_v51 }
  0x41   :  { %184 = vadd.xlane.f32.xlu0 %v183_v53 }
  0x43   :  { %187 = vadd.xlane.f32.xlu1 %v186_v54 }
  0xbe   :  { %v167_v55 = vpop.xlane.xlu0 %166 }
  0xbf   :  { %v202_v58 = vrot.slane %v167_v55, %v843_v6 }
  0xc0   :  { %v173_v56 = vpop.xlane.xlu1 %172 }
  0xc1   :  { %v210_v60 = vrot.slane %v173_v56, %v843_v6 }
  0xc2   :  { %v170_v57 = vpop.xlane.xlu0 %169 }
  0xc3   :  { %v206_v59 = vrot.slane %v170_v57, %v843_v6 }
  0xc4   :  { %v176_v61 = vpop.xlane.xlu1 %175 }
  0xc5   :  { %v232_v62 = vsel %vm231_vm1, %v206_v59, %v202_v58  ;;  %v214_v63 = vrot.slane %v176_v61, %v843_v6 }
  0xc6   :  { %v234_v0 = vsel %vm233_vm2, %v210_v60, %v232_v62  ;;  %v179_v1 = vpop.xlane.xlu0 %178 }
  0xc7   :  { %v236_v2 = vsel %vm235_vm3, %v214_v63, %v234_v0  ;;  %v218_v4 = vrot.slane %v179_v1, %v843_v6 }
  0xc8   :  { %v182_v5 = vpop.xlane.xlu1 %181 }
  0xc9   :  { %v238_v7 = vsel %vm237_vm4, %v218_v4, %v236_v2  ;;  %v222_v9 = vrot.slane %v182_v5, %v843_v6 }
  0xca   :  { %v185_v11 = vpop.xlane.xlu0 %184 }
  0xcb   :  { %v226_v12 = vrot.slane %v185_v11, %v843_v6  ;;  %v240_v13 = vsel %vm239_vm5, %v222_v9, %v238_v7 }
  0xcc   :  { %v188_v14 = vpop.xlane.xlu1 %187 }
  0xcd   :  { %v230_v16 = vrot.slane %v188_v14, %v843_v6  ;;  %v242_v17 = vsel %vm241_vm6, %v226_v12, %v240_v13 }
  0xcf   :  { %v244_v18 = vsel %vm243_vm7, %v230_v16, %v242_v17 }
  0xd0   :  { %v247_v19 = vsel %vm246_vm8, %v244_v18, -inf }
  0xd1   :  { %248 = vmax.xlane.f32.xlu0 %v247_v19 }
 0x15a   :  { %v249_v26 = vpop.xlane.xlu0 %248 }
 0x15b   :  { %v254_v29 = vrot.slane %v249_v26, %v850_v10  ;;  %v258_v30 = vrot.slane %v249_v26, %v257_v23  ;;  %v262_v31 = vrot.slane %v249_v26, %v261_v24  ;;  %v266_v33 = vrot.slane %v249_v26, %v265_v25 }
 0x15c   :  { %v270_v41 = vrot.slane %v249_v26, %v269_v32  ;;  %v274_v46 = vrot.slane %v249_v26, %v273_v40  ;;  %v278_v51 = vrot.slane %v249_v26, %v277_v45  ;;  %v282_v54 = vrot.slane %v249_v26, %v281_v50 }
 0x15d   :  { %v291_v34 = vsub.f32 %v167_v55, %v254_v29  ;;  %v292_v35 = vsub.f32 %v170_v57, %v258_v30  ;;  %v293_v36 = vsub.f32 %v173_v56, %v262_v31  ;;  %v294_v42 = vsub.f32 %v176_v61, %v266_v33 }
 0x15e   :  { %v295_v47 = vsub.f32 %v179_v1, %v270_v41  ;;  %v296_v52 = vsub.f32 %v182_v5, %v274_v46  ;;  %v297_v55 = vsub.f32 %v185_v11, %v278_v51  ;;  %v298_v59 = vsub.f32 %v188_v14, %v282_v54 }
 0x15f   :  { %v299_v38 = vmul.f32 1.442695, %v291_v34  ;;  %v301_v39 = vmul.f32 1.442695, %v292_v35  ;;  %v303_v43 = vmul.f32 1.442695, %v293_v36 }
 0x160   :  { %v305_v49 = vmul.f32 1.442695, %v294_v42  ;;  %v307_v53 = vmul.f32 1.442695, %v295_v47  ;;  %v309_v56 = vmul.f32 1.442695, %v296_v52 }
 0x161   :  { %692 = vpow2.f32 %v299_v38  ;;  %v311_v60 = vmul.f32 1.442695, %v297_v55  ;;  %v313_v62 = vmul.f32 1.442695, %v298_v59 }
 0x162   :  { %694 = vpow2.f32 %v301_v39 }
 0x163   :  { %696 = vpow2.f32 %v303_v43 }
 0x164   :  { %698 = vpow2.f32 %v305_v49 }
 0x165   :  { %700 = vpow2.f32 %v307_v53 }
 0x166   :  { %702 = vpow2.f32 %v309_v56 }
 0x167   :  { %704 = vpow2.f32 %v311_v60  ;;  %v547_v60 = vld [vmem:[#allocation7 + $0x18] sm:$0xff] }
 0x168   :  { %706 = vpow2.f32 %v313_v62 }
 0x16e   :  { %v693_v57 = vpop.eup %692 }
 0x16f   :  { %v695_v58 = vpop.eup %694  ;;  %324 = vperm.xlu1 %689, %v693_v57  }
 0x170   :  { %327 = vperm.xlu0 %690, %v695_v58   ;;  %v697_v61 = vpop.eup %696 }
 0x171   :  { %v699_v63 = vpop.eup %698 }
 0x172   :  { %v701_v0 = vpop.eup %700 }
 0x173   :  { %330 = vperm.xlu1 %689, %v697_v61   ;;  %v703_v1 = vpop.eup %702 }
 0x174   :  { %v705_v2 = vpop.eup %704 }
 0x175   :  { %v707_v4 = vpop.eup %706 }
 0x177   :  { %333 = vperm.xlu1 %689, %v699_v63  }
 0x17b   :  { %336 = vperm.xlu1 %689, %v701_v0  }
 0x17f   :  { %339 = vperm.xlu1 %689, %v703_v1  }
 0x183   :  { %342 = vperm.xlu1 %689, %v705_v2  }
 0x187   :  { %345 = vperm.xlu1 %689, %v707_v4  }
 0x1ea   :  { %v325_v5 = vpop.permute.xlu1 %324 }
 0x1eb   :  { %v328_v12 = vpop.permute.xlu0 %327  ;;  %v350_v16 = vrot.slane %v325_v5, %v843_v6 }
 0x1ec   :  { %v354_v14 = vrot.slane %v328_v12, %v843_v6 }
 0x1ee   :  { %v331_v7 = vpop.permute.xlu1 %330  ;;  %v379_v26 = vsel %vm231_vm1, %v354_v14, %v350_v16 }
 0x1ef   :  { %v358_v17 = vrot.slane %v331_v7, %v843_v6 }
 0x1f1   :  { %v380_v30 = vsel %vm233_vm2, %v358_v17, %v379_v26 }
 0x1f2   :  { %v334_v9 = vpop.permute.xlu1 %333 }
 0x1f3   :  { %v362_v18 = vrot.slane %v334_v9, %v843_v6 }
 0x1f5   :  { %v381_v33 = vsel %vm235_vm3, %v362_v18, %v380_v30 }
 0x1f6   :  { %v337_v11 = vpop.permute.xlu1 %336 }
 0x1f7   :  { %v366_v19 = vrot.slane %v337_v11, %v843_v6 }
 0x1f9   :  { %v382_v34 = vsel %vm237_vm4, %v366_v19, %v381_v33 }
 0x1fa   :  { %v340_v13 = vpop.permute.xlu1 %339 }
 0x1fb   :  { %v370_v29 = vrot.slane %v340_v13, %v843_v6 }
 0x1fd   :  { %v383_v36 = vsel %vm239_vm5, %v370_v29, %v382_v34 }
 0x1fe   :  { %v343_v22 = vpop.permute.xlu1 %342 }
 0x1ff   :  { %v374_v31 = vrot.slane %v343_v22, %v843_v6 }
 0x201   :  { %v384_v39 = vsel %vm241_vm6, %v374_v31, %v383_v36 }
 0x202   :  { %v346_v35 = vpop.permute.xlu1 %345 }
 0x203   :  { %v378_v38 = vrot.slane %v346_v35, %v843_v6 }
 0x205   :  { %v385_v41 = vsel %vm243_vm7, %v378_v38, %v384_v39 }
 0x206   :  { %v387_v42 = vsel %vm246_vm8, %v385_v41, 0.0 }
 0x207   :  { %388 = vadd.xlane.f32.xlu1 %v387_v42 }
 0x290   :  { %v389_v43 = vpop.xlane.xlu1 %388 }
 0x291   :  { %708 = vrcp.f32 %v389_v43 }
 0x29e   :  { %v709_v46 = vpop.eup %708 }
 0x29f   :  { %v395_v47 = vrot.slane %v709_v46, %v850_v10  ;;  %v399_v51 = vrot.slane %v709_v46, %v257_v23  ;;  %v403_v6 = vrot.slane %v709_v46, %v261_v24  ;;  %v407_v54 = vrot.slane %v709_v46, %v265_v25 }
 0x2a0   :  { %v411_v56 = vrot.slane %v709_v46, %v269_v32  ;;  %v415_v23 = vrot.slane %v709_v46, %v273_v40  ;;  %v419_v24 = vrot.slane %v709_v46, %v277_v45  ;;  %v423_v25 = vrot.slane %v709_v46, %v281_v50  ;;  %v545_v40 = vld [vmem:[#allocation7 + $0x8] sm:$0xff]  ;;  %v544_v45 = vld [vmem:[#allocation7] sm:$0xff] }
 0x2a1   :  { %v432_v49 = vmul.f32 %v693_v57, %v395_v47  ;;  %v433_v52 = vmul.f32 %v695_v58, %v399_v51  ;;  %v434_v53 = vmul.f32 %v697_v61, %v403_v6  ;;  %v435_v55 = vmul.f32 %v699_v63, %v407_v54  ;;  %v546_v61 = vld [vmem:[#allocation7 + $0x10] sm:$0xff] }
 0x2a2   :  { %v436_v10 = vmul.f32 %v701_v0, %v411_v56  ;;  %v437_v57 = vmul.f32 %v703_v1, %v415_v23  ;;  %v438_v58 = vmul.f32 %v705_v2, %v419_v24  ;;  %v439_v59 = vmul.f32 %v707_v4, %v423_v25 }
 0x2a3   :  { %442 = vperm.xlu0 %690, %v432_v49   ;;  %v803_v32 = vmov 0.0  }
 0x2a4   :  { %668 = vmatprep.subr.mxu0 %v803_v32  ;;  %676 = vmatprep.mubr.msk.f32.mxu0 %vm804_vm9, %v803_v32 }
 0x2a5   :  { %669 = vmatpush3.msra.mxu0 %v547_v60 }
 0x2a6   :  { %670 = vmatprep.subr.mxu0 %v803_v32 }
 0x2a7   :  { %447 = vperm.xlu0 %690, %v433_v52   ;;  %671 = vmatpush3.msra.mxu0 %v546_v61 }
 0x2a8   :  { %672 = vmatprep.subr.mxu0 %v803_v32 }
 0x2a9   :  { %673 = vmatpush3.msra.mxu0 %v545_v40 }
 0x2aa   :  { %674 = vmatprep.subr.mxu0 %v803_v32 }
 0x2ab   :  { %452 = vperm.xlu0 %690, %v434_v53   ;;  %675 = vmatpush3.msra.mxu0 %v544_v45 }
 0x2af   :  { %457 = vperm.xlu0 %690, %v435_v55  }
 0x2b3   :  { %462 = vperm.xlu0 %690, %v436_v10  }
 0x2b7   :  { %467 = vperm.xlu0 %690, %v437_v57  }
 0x2bb   :  { %472 = vperm.xlu0 %690, %v438_v58  }
 0x2bf   :  { %477 = vperm.xlu0 %690, %v439_v59  }
 0x31e   :  { %v443_v3 = vpop.permute.xlu0 %442 }
 0x31f   :  { %v480_v0 = vmul.f32 %v443_v3, %v854_v15 }
 0x321   :  { %v488_v7 = vsel %vm164_vm0, %v480_v0, 0.0 }
 0x322   :  { %v448_v50 = vpop.permute.xlu0 %447  ;;  %v489_v14 = vrot.slane %v488_v7, 4 }
 0x323   :  { %v481_v62 = vmul.f32 %v448_v50, %v859_v21 }
 0x324   :  { %v490_v19 = vadd.f32 %v489_v14, %v488_v7 }
 0x325   :  { %v495_v2 = vsel %vm164_vm0, %v481_v62, 0.0 }
 0x326   :  { %v453_v63 = vpop.permute.xlu0 %452  ;;  %v496_v11 = vrot.slane %v495_v2, 4  ;;  %v491_v35 = vrot.slane %v490_v19, 2 }
 0x327   :  { %v482_v1 = vmul.f32 %v453_v63, %v857_v20 }
 0x328   :  { %v497_v17 = vadd.f32 %v496_v11, %v495_v2  ;;  %v492_v49 = vadd.f32 %v491_v35, %v490_v19 }
 0x329   :  { %v502_v4 = vsel %vm164_vm0, %v482_v1, 0.0 }
 0x32a   :  { %v458_v5 = vpop.permute.xlu0 %457  ;;  %v503_v12 = vrot.slane %v502_v4, 4 }
 0x32b   :  { %v483_v9 = vmul.f32 %v458_v5, %v866_v28  ;;  %v498_v28 = vrot.slane %v497_v17, 2 }
 0x32c   :  { %v504_v20 = vadd.f32 %v503_v12, %v502_v4 }
 0x32d   :  { %v509_v13 = vsel %vm164_vm0, %v483_v9, 0.0  ;;  %v499_v42 = vadd.f32 %v498_v28, %v497_v17 }
 0x32e   :  { %v510_v21 = vrot.slane %v509_v13, 4  ;;  %v463_v16 = vpop.permute.xlu0 %462  ;;  %v505_v33 = vrot.slane %v504_v20, 2 }
 0x32f   :  { %v484_v15 = vmul.f32 %v463_v16, %v864_v27  ;;  %v500_v55 = vrot.slane %v499_v42, 1 }
 0x330   :  { %v511_v22 = vadd.f32 %v510_v21, %v509_v13  ;;  %v506_v46 = vadd.f32 %v505_v33, %v504_v20 }
 0x331   :  { %v516_v18 = vsel %vm164_vm0, %v484_v15, 0.0  ;;  %v501_v60 = vadd.f32 %v500_v55, %v499_v42  ;;  %v662_v15 = vld [vmem:[%s998_s3] ss:$0 sm:$0xff] }
 0x332   :  { %v517_v26 = vrot.slane %v516_v18, 4  ;;  %v468_v29 = vpop.permute.xlu0 %467  ;;  %v512_v36 = vrot.slane %v511_v22, 2  ;;  %v507_v23 = vrot.slane %v506_v46, 1 }
 0x333   :  { %v485_v30 = vmul.f32 %v468_v29, %v874_v37 }
 0x334   :  { %v518_v31 = vadd.f32 %v517_v26, %v516_v18  ;;  %v513_v51 = vadd.f32 %v512_v36, %v511_v22  ;;  %v508_v45 = vadd.f32 %v507_v23, %v506_v46 }
 0x335   :  { %v523_v34 = vsel %vm164_vm0, %v485_v30, 0.0 }
 0x336   :  { %v524_v38 = vrot.slane %v523_v34, 4  ;;  %v473_v39 = vpop.permute.xlu0 %472  ;;  %v519_v27 = vrot.slane %v518_v31, 2  ;;  %v514_v24 = vrot.slane %v513_v51, 1 }
 0x337   :  { %v486_v41 = vmul.f32 %v473_v39, %v881_v44  ;;  %v493_v44 = vrot.slane %v492_v49, 1 }
 0x338   :  { %v525_v43 = vadd.f32 %v524_v38, %v523_v34  ;;  %v520_v53 = vadd.f32 %v519_v27, %v518_v31  ;;  %v515_v50 = vadd.f32 %v514_v24, %v513_v51 }
 0x339   :  { %v530_v47 = vsel %vm164_vm0, %v486_v41, 0.0  ;;  %v494_v3 = vadd.f32 %v493_v44, %v492_v49 }
 0x33a   :  { %v526_v37 = vrot.slane %v525_v43, 2  ;;  %v531_v52 = vrot.slane %v530_v47, 4  ;;  %v478_v6 = vpop.permute.xlu0 %477  ;;  %v521_v59 = vrot.slane %v520_v53, 1 }
 0x33b   :  { %v487_v54 = vmul.f32 %v478_v6, %v886_v48  ;;  %v556_v0 = vsel %vm231_vm1, %v501_v60, %v494_v3 }
 0x33c   :  { %v527_v56 = vadd.f32 %v526_v37, %v525_v43  ;;  %v532_v10 = vadd.f32 %v531_v52, %v530_v47  ;;  %v522_v63 = vadd.f32 %v521_v59, %v520_v53  ;;  %v557_v4 = vsel %vm233_vm2, %v508_v45, %v556_v0 }
 0x33d   :  { %v537_v57 = vsel %vm164_vm0, %v487_v54, 0.0  ;;  %v558_v7 = vsel %vm235_vm3, %v515_v50, %v557_v4 }
 0x33e   :  { %v533_v58 = vrot.slane %v532_v10, 2  ;;  %v538_v25 = vrot.slane %v537_v57, 4  ;;  %v528_v32 = vrot.slane %v527_v56, 1  ;;  %v559_v11 = vsel %vm237_vm4, %v522_v63, %v558_v7 }
 0x340   :  { %v534_v61 = vadd.f32 %v533_v58, %v532_v10  ;;  %v539_v40 = vadd.f32 %v538_v25, %v537_v57  ;;  %v529_v1 = vadd.f32 %v528_v32, %v527_v56 }
 0x342   :  { %v535_v62 = vrot.slane %v534_v61, 1  ;;  %v540_v48 = vrot.slane %v539_v40, 2  ;;  %v560_v13 = vsel %vm239_vm5, %v529_v1, %v559_v11 }
 0x344   :  { %v541_v2 = vadd.f32 %v540_v48, %v539_v40  ;;  %v536_v5 = vadd.f32 %v535_v62, %v534_v61 }
 0x346   :  { %v542_v9 = vrot.slane %v541_v2, 1  ;;  %v561_v14 = vsel %vm241_vm6, %v536_v5, %v560_v13 }
 0x348   :  { %v543_v12 = vadd.f32 %v542_v9, %v541_v2 }
 0x34a   :  { %v562_v21 = vsel %vm243_vm7, %v543_v12, %v561_v14 }
 0x34b   :  { %677 = vmatmul.mubr.msk.f32.vlgmr.msra.gmra.mxu0 %vm164_vm0, %v562_v21 }
 0x40b   :  { %v631_v16 = vpop.f32.mrf.mxu0 }
 0x40c   :  { %v635_v17 = vadd.f32 %v631_v16, %v846_v8 }
 0x40d   :  { %v678_v20 = vpop.f32.mrf.mxu0 }
 0x40e   :  { %v643_v18 = vadd.f32 %v662_v15, %v635_v17 }
 0x410   :  { %644 = vst.msk [vmem:[#allocation8] sm:$0xff] %vm164_vm0, %v643_v18 }
 0x411   :  { %781 = shalt.err (!%p778_p5)
}
 0x412   :  { %654 = dma.vmem_to_hbm [thread:$0]  %s652_s6, 128, %s999_s4, [#allocation4]  }
 0x413   :  { %794 = dma.done.wait [#allocation4], 128  }
 0x414   :  { %795 = vsyncadd [#allocation4], 4294967168 }
 0x415   :  { %658 = vsyncpa [#allocation3], 1 }
 0x416   :  { %659 = vsyncpa [#allocation6], 1 }
 0x417   :  { %660 = vsyncpa [#allocation4], 1 }

</bundles_post_ra>
